<compile_context>
chip_gen: v7x
topology: tpu7x:2x2x1
jax: 0.10.0
libtpu: 0.0.40
codegen_flags: <defaults>
</compile_context>

<pallas_src>
import jax
import jax.numpy as jnp
from jax import lax
from jax.experimental import pallas as pl
from jax.experimental.pallas import tpu as pltpu


def _mlp_kernel(x_ref, w_ref, b_ref, o_ref):
    # x_ref: (C, t)  channel-major spatial tile (batch dim squeezed)
    # w_ref: (C, N)  full weight, VMEM-resident across the grid
    # b_ref: (1, N)  bias row, VMEM-resident
    # o_ref: (t, N)  output tile (token-major), written with a contiguous DMA
    acc = lax.dot_general(
        x_ref[...], w_ref[...],
        dimension_numbers=(((0,), (0,)), ((), ())),  # contract channels: fused transpose
        preferred_element_type=jnp.float32,          # f32 accumulation on the MXU
    )                                                # -> (t, N)
    o_ref[...] = (acc + b_ref[...].astype(jnp.float32)).astype(o_ref.dtype)


def _pick_spatial_tile(HW, C, N, itemsize, batch, t_target):
    """Choose the per-step token-tile size.

    Large enough to amortize the ~0.35 us grid-step overhead and give multi-KiB
    contiguous DMA runs, small enough that the double-buffered working set stays
    within a conservative VMEM budget (fits v5e's 16 MiB default scoped VMEM).
    """
    budget = 12 * 1024 * 1024
    resident = 2 * (C * N + N) * itemsize          # weight + bias (double-buffered)
    per_token = 2 * (C + N) * itemsize             # input + output tiles, double-buffered
    t_vmem = max(128, (budget - resident) // per_token)
    t = min(t_target, t_vmem)

    # v7x has 2 TensorCores sharded over the parallel grid axes: when B == 1 make
    # sure the spatial axis still yields >= 2 grid steps (no effect on v5e/v6e).
    if batch == 1 and HW > 256:
        half = -(-HW // 2)                 # ceil(HW / 2)
        half = -(-half // 128) * 128       # round up to a 128-lane multiple
        if half < HW:
            t = min(t, half)

    if HW <= t:
        return HW                          # single full-extent tile (any alignment OK)
    return max(128, (t // 128) * 128)      # 128-lane multiple; ragged tail is masked


def mlp_forward(x_nchw, weight, bias, *, t_hw=8192):
    """x_nchw: (B, C, H, W); weight: (embed_dim, C) [PyTorch layout]; bias: (embed_dim,)."""
    B, C, H, W = x_nchw.shape
    N = weight.shape[0]
    HW = H * W

    x3d = x_nchw.reshape(B, C, HW)      # free contiguous view of NCHW (no transpose pass)
    w_t = weight.T                      # (C, N): kernel contracts the channel axis
    b2d = bias.reshape(1, N)

    in_size = jnp.dtype(x3d.dtype).itemsize
    out_dtype = x3d.dtype
    out_size = jnp.dtype(out_dtype).itemsize

    t = _pick_spatial_tile(HW, C, N, in_size, B, t_hw)
    n_hw_tiles = pl.cdiv(HW, t)         # ragged tail handled by Pallas block masking
    grid = (B, n_hw_tiles)

    out = pl.pallas_call(
        _mlp_kernel,
        out_shape=jax.ShapeDtypeStruct((B, HW, N), out_dtype),
        grid_spec=pltpu.PrefetchScalarGridSpec(
            num_scalar_prefetch=0,
            grid=grid,
            in_specs=[
                pl.BlockSpec((None, C, t), lambda b, i: (b, 0, i)),  # x tile, batch squeezed
                pl.BlockSpec((C, N), lambda b, i: (0, 0)),           # full weight, resident
                pl.BlockSpec((1, N), lambda b, i: (0, 0)),           # bias row, resident
            ],
            out_specs=pl.BlockSpec((None, t, N), lambda b, i: (b, i, 0)),
        ),
        compiler_params=pltpu.CompilerParams(
            dimension_semantics=("parallel", "parallel"),
        ),
        cost_estimate=pl.CostEstimate(
            flops=2 * B * HW * C * N,
            bytes_accessed=in_size * (B * C * HW + C * N + N) + out_size * B * HW * N,
            transcendentals=0,
        ),
    )(x3d, w_t, b2d)

    return out


def _reference(x_nchw, weight, bias):
    B, C, H, W = x_nchw.shape
    x_tokens = jnp.transpose(x_nchw.reshape(B, C, H * W), (0, 2, 1))
    return jnp.einsum("bsc,nc->bsn", x_tokens, weight) + bias


if __name__ == "__main__":
    key = jax.random.PRNGKey(0)
    k_x, k_w, k_b = jax.random.split(key, 3)

    # Small shapes consistent with the module: input_dim=C=32, embed_dim=64
    B, C, H, W = 2, 32, 8, 8
    embed_dim = 64

    x = jax.random.normal(k_x, (B, C, H, W), dtype=jnp.float32)

    # Deterministic nn.Linear-style init: U(-1/sqrt(in_dim), 1/sqrt(in_dim))
    bound = 1.0 / (C ** 0.5)
    weight = jax.random.uniform(k_w, (embed_dim, C), minval=-bound, maxval=bound,
                                dtype=jnp.float32)
    bias = jax.random.uniform(k_b, (embed_dim,), minval=-bound, maxval=bound,
                              dtype=jnp.float32)

    out = mlp_forward(x, weight, bias)
    jax.block_until_ready(out)

    ref = _reference(x, weight, bias)
    assert out.shape == (B, H * W, embed_dim)
    assert jnp.allclose(out, ref, atol=1e-4, rtol=1e-4), "mismatch vs reference"

    print("KERNEL_OK")
</pallas_src>

<mosaic_0001>
module attributes {stable_mosaic.version = 11 : i64} {
  func.func @_mlp_kernel(%arg0: i32, %arg1: i32, %arg2: memref<1x32x64xf32, #tpu.memory_space<vmem>>, %arg3: memref<32x64xf32, #tpu.memory_space<vmem>>, %arg4: memref<1x64xf32, #tpu.memory_space<vmem>>, %arg5: memref<1x64x64xf32, #tpu.memory_space<vmem>>) attributes {dimension_semantics = [#tpu.dimension_semantics<parallel>, #tpu.dimension_semantics<parallel>], iteration_bounds = array<i64: 2, 1>, scalar_prefetch = 0 : i64, scratch_operands = 0 : i64, tpu.core_type = #tpu.core_type<tc>, window_params = [{transform_indices = @transform_0, window_bounds = array<i64: 1, 32, 64>}, {pipeline_mode = #tpu.pipeline_mode<synchronous>, transform_indices = @transform_1, window_bounds = array<i64: 32, 64>}, {pipeline_mode = #tpu.pipeline_mode<synchronous>, transform_indices = @transform_2, window_bounds = array<i64: 1, 64>}, {transform_indices = @transform_3, window_bounds = array<i64: 1, 64, 64>}]} {
    %c0 = arith.constant 0 : index
    %c0_0 = arith.constant 0 : index
    %c0_1 = arith.constant 0 : index
    %0 = vector.load %arg2[%c0, %c0_0, %c0_1] : memref<1x32x64xf32, #tpu.memory_space<vmem>>, vector<1x32x64xf32>
    %1 = vector.shape_cast %0 : vector<1x32x64xf32> to vector<32x64xf32>
    %c0_2 = arith.constant 0 : index
    %c0_3 = arith.constant 0 : index
    %2 = vector.load %arg3[%c0_2, %c0_3] : memref<32x64xf32, #tpu.memory_space<vmem>>, vector<32x64xf32>
    %cst = arith.constant dense<0.000000e+00> : vector<64x64xf32>
    %3 = tpu.matmul %1, %2, %cst {dimension_numbers = #tpu.dot_dimension_numbers<[0], [0], [1], [1], [0, 1, 1, 1], [], []>} : vector<32x64xf32>, vector<32x64xf32>, vector<64x64xf32> -> vector<64x64xf32>
    %c0_4 = arith.constant 0 : index
    %c0_5 = arith.constant 0 : index
    %4 = vector.load %arg4[%c0_4, %c0_5] : memref<1x64xf32, #tpu.memory_space<vmem>>, vector<1x64xf32>
    %5 = vector.broadcast %4 : vector<1x64xf32> to vector<64x64xf32>
    %6 = arith.addf %3, %5 : vector<64x64xf32>
    %c0_6 = arith.constant 0 : index
    %c0_7 = arith.constant 0 : index
    %c0_8 = arith.constant 0 : index
    %7 = vector.load %arg5[%c0_6, %c0_7, %c0_8] : memref<1x64x64xf32, #tpu.memory_space<vmem>>, vector<1x64x64xf32>
    %8 = vector.shape_cast %7 : vector<1x64x64xf32> to vector<64x64xf32>
    %9 = vector.shape_cast %6 : vector<64x64xf32> to vector<1x64x64xf32>
    tpu.vector_store %arg5[%c0_6, %c0_7, %c0_8], %9 {strides = array<i32>} : memref<1x64x64xf32, #tpu.memory_space<vmem>>, vector<1x64x64xf32>,
    return
  }
  func.func @transform_0(%arg0: i32, %arg1: i32) -> (i32, i32, i32) {
    %c0_i32 = arith.constant 0 : i32
    %c0_i32_0 = arith.constant 0 : i32
    return %arg0, %c0_i32, %arg1 : i32, i32, i32
  }
  func.func @transform_1(%arg0: i32, %arg1: i32) -> (i32, i32) {
    %c0_i32 = arith.constant 0 : i32
    %c0_i32_0 = arith.constant 0 : i32
    %c0_i32_1 = arith.constant 0 : i32
    return %c0_i32, %c0_i32_0 : i32, i32
  }
  func.func @transform_2(%arg0: i32, %arg1: i32) -> (i32, i32) {
    %c0_i32 = arith.constant 0 : i32
    %c0_i32_0 = arith.constant 0 : i32
    %c0_i32_1 = arith.constant 0 : i32
    return %c0_i32, %c0_i32_0 : i32, i32
  }
  func.func @transform_3(%arg0: i32, %arg1: i32) -> (i32, i32, i32) {
    %c0_i32 = arith.constant 0 : i32
    %c0_i32_0 = arith.constant 0 : i32
    return %arg0, %arg1, %c0_i32 : i32, i32, i32
  }
}

</mosaic_0001>

<bundles_post_ra>
// kernel: tpu_custom_call.1
= control target key start
LH: loop header
LB: loop body
LE: loop exit
PB: predicated region body
PF: predicated region fallthrough
CT: control target
= control target key end

     0   :  { %8 = vsyncpa [#allocation3], 0  ;;  %s1088_s0 = inlined_call_operand.hbm [shape: f32[2,32,64], index: 0, kind: input, shape index: {}]   ;;  %s1089_s1 = inlined_call_operand.hbm [shape: f32[32,64], index: 1, kind: input, shape index: {}]   ;;  %s1090_s2 = inlined_call_operand.vmem [shape: f32[1,64], index: 2, kind: input, shape index: {}]   ;;  %s1091_s3 = inlined_call_operand.hbm [shape: f32[2,64,64], index: 3, kind: output, shape index: {}]  }
   0x1   :  { %10 = vsyncpa [#allocation3 + $0x1], 0 }
   0x2   :  { %11 = vsyncpa [#allocation6], 0 }
   0x3   :  { %12 = vsyncpa [#allocation4], 0 }
   0x4   :  { %14 = vsyncpa [#allocation4 + $0x1], 0  ;;  %s843_s12 = smov 0   ;;  %s845_s13 = smov 0  }
   0x5   :  { %s847_s14 = smov 0   ;;  %s849_s15 = smov 0  }
   0x6   :  { %s851_s16 = smov 0   ;;  %s853_s17 = smov 0  }
   0x7 LB: > { %s520_s18 = sadd.s32 4294967295, %s814_s17   ;;  %s521_s19 = sadd.s32 4294967294, %s814_s17   ;;  %s814_s17 = sphi %s853_s17, %s20_s17   ;;  %s810_s16 = sphi %s851_s16, %s1115_s16   ;;  %s806_s15 = sphi %s849_s15, %s1114_s15   ;;  %s802_s14 = sphi %s847_s14, %s1113_s14   ;;  %s798_s13 = sphi %s845_s13, %s1112_s13   ;;  %s794_s12 = sphi %s843_s12, %s1111_s12  }
   0x8   : > { %p54_p0 = scmp.ne.s32.totalorder %s798_s13, %s794_s12  ;;  %p877_p1 = scmp.eq.s32.totalorder %s520_s18, 0 }
   0x9   : > { %p881_p2 = scmp.eq.s32.totalorder %s520_s18, 1  ;;  %p128_p3 = scmp.eq.s32.totalorder %s521_s19, 1 }
   0xa   : > { %s1096_s20 = scalar_select %p877_p1, 1, 0 }
   0xb   : > { %s1097_s21 = scalar_select %p881_p2, 1, 0 }
   0xc   : > { %p887_p4 = por %p877_p1, %p54_p0  ;;  %p522_p5 = scmp.ge.s32.totalorder %s814_s17, 1 }
   0xd   : > { %p892_p6 = por %p128_p3, %p54_p0  ;;  %p135_p7 = scmp.lt.s32.totalorder %s814_s17, 3 }
   0xe   : > { %s1098_s22 = scalar_select %p887_p4, 1, 0 }
   0xf   : > { %s1099_s23 = scalar_select %p892_p6, 1, 0 }
  0x10   : > { %p897_p8 = pnand %p522_p5, %p135_p7  ;;  %s816_s25 = smov [#allocation5]  }
  0x11   : > { %s147_s26 = sshll.u32 %s816_s25, 4  ;;  %s32_s28 = sadd.s32 1, %s810_s16  ;;  %s148_s26 = int_to_ptr.vmem [resolvable:$true] %s147_s26 }
  0x12   : > { %s1100_s24 = scalar_select %p897_p8, 1, 0 }
  0x13   : > { %p600_p9 = pneg %p897_p8  ;;  %s670_s4 = scalar_lea.hbm %s1089_s1, 512 }
  0x14   : > { %p671_p12 = scmp.ne.s32.totalorder %s1089_s1, %s670_s4  ;;  %p677_p5 = scmp.lt.u32.totalorder %s670_s4, %s1089_s1 }
  0x15   : > { %p906_p11 = pnand %p600_p9, %p877_p1 }
  0x17   : > { %p672_p13 = pneg %p906_p11 }
  0x19   : > { %p673_p0 = pnand %p672_p13, %p671_p12 }
  0x1b   : > { %p674_p3 = pneg %p673_p0 }
  0x1d   : > { %p679_p7 = pnand %p677_p5, %p674_p3 }
  0x1f   : > { %682 = shalt.err (!%p679_p7)
}
  0x20   : > { %s683_s9 = scalar_lea.vmem %s148_s26, 512  ;;  %p691_p1 = scmp.lt.s32.totalorder %s148_s26, %s148_s26 }
  0x21   : > { %p684_p9 = scmp.ne.s32.totalorder %s148_s26, %s683_s9  ;;  %p692_p4 = scmp.lt.s32.totalorder %s683_s9, %s683_s9 }
  0x23   : > { %p686_p10 = pnand %p684_p9, %p672_p13  ;;  %p693_p8 = por %p692_p4, %p691_p1 }
  0x25   : > { %p687_p6 = pneg %p686_p10 }
  0x27   : > { %p694_p2 = pnand %p693_p8, %p687_p6 }
  0x29   : > { %697 = shalt.err (!%p694_p2)
}
  0x2a   : > { %s817_s10 = smov 128   ;;  %s818_s11 = smov 8  }
  0x2b   : > { %603 = dma.hbm_to_vmem [thread:$0]  (!%p906_p11), %s1089_s1, 512, %s148_s26, [#allocation6], %s817_s10, %s817_s10, %s818_s11  }
  0x2c   : > { %p34_p1 = scmp.ge.s32.totalorder %s32_s28, 2  ;;  %s41_s25 = sadd.s32 1, %s802_s14 }
  0x2d   : > { %p48_p2 = scmp.ne.s32.totalorder %s802_s14, %s798_s13  ;;  %p49_p4 = scmp.eq.s32.totalorder %s814_s17, 0 }
  0x2e   : > { %s1117_s28 = smov (%p34_p1, %s32_s28), 0  ;;  %p1103_p8 = scmp.ne.s32.totalorder %s1097_s21, 0 }
  0x2f   : > { %p936_p6 = por %p49_p4, %p48_p2  ;;  %s36_s30 = ssub.s32 %s810_s16, %s1117_s28 }
  0x30   : > { %p942_p10 = por %p1103_p8, %p48_p2  ;;  %p613_p12 = scmp.lt.s32.totalorder %s814_s17, 2 }
  0x31   : > { %p39_p11 = scmp.eq.s32.totalorder %s36_s30, 0  ;;  %s164_s26 = sand.u32 1, %s802_s14  }
  0x32   : > { %s525_s4 = sshll.u32 %s164_s26, 5  ;;  %s546_s6 = sshll.u32 %s810_s16, 9 }
  0x33   : > { %s951_s5 = scalar_select %p39_p11, %s802_s14, %s41_s25  }
  0x34   : > { %s957_s9 = scalar_lea.hbm %s1088_s0, %s546_s6  ;;  %s168_s21 = scalar_lea.vmem [#allocation2], %s525_s4 }
  0x35   : > { %s176_s18 = sshll.u32 %s168_s21, 4  ;;  %p963_p13 = pnand %p613_p12, %p936_p6  ;;  %s959_s18 = int_to_ptr.vmem [resolvable:$true] %s176_s18 }
  0x36   : > { %s967_s25 = scalar_lea.sflag [#allocation3], %s164_s26  ;;  %s698_s30 = scalar_lea.hbm %s957_s9, 512 }
  0x37   : > { %p699_p0 = scmp.ne.s32.totalorder %s957_s9, %s698_s30  ;;  %p700_p3 = pneg %p963_p13 }
  0x38   : > { %s703_s29 = scalar_lea.hbm %s1088_s0, 1024  ;;  %p704_p9 = scmp.lt.u32.totalorder %s957_s9, %s1088_s0 }
  0x39   : > { %p701_p5 = pnand %p700_p3, %p699_p0  ;;  %p705_p1 = scmp.lt.u32.totalorder %s703_s29, %s698_s30 }
  0x3a   : > { %p707_p4 = scmp.lt.u32.totalorder %s698_s30, %s957_s9 }
  0x3b   : > { %p702_p7 = pneg %p701_p5  ;;  %p706_p2 = por %p705_p1, %p704_p9 }
  0x3d   : > { %p708_p6 = por %p707_p4, %p706_p2 }
  0x3f   : > { %p709_p8 = pnand %p708_p6, %p702_p7 }
  0x41   : > { %712 = shalt.err (!%p709_p8)
}
  0x42   : > { %s713_s26 = scalar_lea.vmem %s959_s18, 512  ;;  %s819_s21 = smov [#allocation2]  }
  0x43   : > { %p714_p12 = scmp.ne.s32.totalorder %s959_s18, %s713_s26  ;;  %s718_s4 = sshll.u32 %s819_s21, 4  ;;  %s719_s4 = int_to_ptr.vmem [resolvable:$false] %s718_s4 }
  0x44   : > { %s720_s6 = scalar_lea.vmem %s719_s4, 1024  ;;  %p721_p5 = scmp.lt.s32.totalorder %s959_s18, %s719_s4 }
  0x45   : > { %p716_p11 = pnand %p714_p12, %p700_p3  ;;  %p722_p9 = scmp.lt.s32.totalorder %s720_s6, %s713_s26 }
  0x47   : > { %p717_p0 = pneg %p716_p11  ;;  %p723_p1 = por %p722_p9, %p721_p5 }
  0x49   : > { %p724_p2 = pnand %p723_p1, %p717_p0 }
  0x4b   : > { %727 = shalt.err (!%p724_p2)
}
  0x4c   : > { %607 = dma.hbm_to_vmem [thread:$0]  (!%p963_p13), %s957_s9, 512, %s959_s18, %s967_s25, %s817_s10, %s817_s10, %s818_s11  }
  0x4d   : > { %p1106_p3 = scmp.ne.s32.totalorder %s1100_s24, 0 }
  0x4e   : > { %s1001_s30 = sand.u32 (!%p1106_p3), 1, %s798_s13   ;;  %p1107_p7 = scmp.ne.s32.totalorder (!%p1106_p3), %s1098_s22, 0 }
  0x4f   : > { %188 = sbr.rel (%p1106_p3) target bundleno = 478 (0x1de), region = 32  ;;  %s529_s29 = sshll.u32 (!%p1106_p3), %s1001_s30, 5 }
  0x50   : > { %s191_s7 = scalar_lea.sflag (!%p1106_p3), [#allocation3], %s1001_s30  ;;  %s194_s8 = scalar_lea.vmem (!%p1106_p3), [#allocation2], %s529_s29 }
  0x56   : > { %781 = dma.done.wait (%p1107_p7), %s191_s7, 512  }
  0x57   : > { %783 = vsyncadd (%p1107_p7), %s191_s7, 4294966784  ;;  %p1108_p4 = scmp.ne.s32.totalorder %s1096_s20, 0 }
  0x59   : > { %785 = dma.done.wait (%p1108_p4), [#allocation6], 512  }
  0x5a   : > { %787 = vsyncadd (%p1108_p4), [#allocation6], 4294966784  ;;  %v222_v0 = vld [vmem:[%s194_s8] sm:$0xff]  ;;  %v227_v2 = vld [vmem:[#allocation5 + $0x8] sm:$0xff]  ;;  %vm269_vm0 = vcmask 261120   ;;  %s531_s20 = sshll.u32 %s1001_s30, 6 }
  0x5b   : > { %237 = vxpose.xlu0.b32.start [1/4] (short) (narrow) %v222_v0, 64  ;;  %v226_v1 = vld [vmem:[#allocation5] sm:$0xff]  ;;  %v223_v3 = vld [vmem:[%s194_s8 + $0x8] sm:$0xff]  ;;  %v228_v5 = vld [vmem:[#allocation5 + $0x10] sm:$0xff]  ;;  %vm399_vm1 = vcmask 523264   ;;  %s220_s10 = scalar_lea.vmem [#allocation7], %s531_s20 }
  0x5c   : > { %v580_v4 = vpack.c.bf16 %v227_v2, %v226_v1  ;;  %v229_v6 = vld [vmem:[#allocation5 + $0x18] sm:$0xff]  ;;  %v224_v8 = vld [vmem:[%s194_s8 + $0x10] sm:$0xff]  ;;  %v532_v18 = vld [vmem:[%s1090_s2] ss:$0 sm:$0xff]  ;;  %s547_s11 = sshll.u32 %s806_s15, 10  ;;  %s424_s9 = sshll.u32 %s220_s10, 4  ;;  %s1037_s9 = int_to_ptr.vmem [resolvable:$true] %s424_s9 }
  0x5d   : > { %v584_v7 = vpack.c.bf16 %v229_v6, %v228_v5  ;;  %v225_v9 = vld [vmem:[%s194_s8 + $0x18] sm:$0xff]  ;;  %s1035_s25 = scalar_lea.hbm %s1091_s3, %s547_s11  ;;  %s409_s15 = scalar_lea.sflag [#allocation4], %s1001_s30 }
  0x5e   : > { %581 = vmatprep.subr.bf16.mxu0 %v580_v4  ;;  %588 = vmatprep.subr.bf16.mxu1 %v580_v4  ;;  %s728_s26 = scalar_lea.vmem %s1037_s9, 1024  ;;  %s820_s21 = smov [#allocation7]  }
  0x5f   : > { %238 = vxpose.xlu0.b32.cont [2/4] (short) (narrow) %v223_v3, 64  ;;  %583 = vmatpush3.bf16.msra.mxu0 %v580_v4  ;;  %p729_p13 = scmp.ne.s32.totalorder %s1037_s9, %s728_s26  ;;  %s732_s4 = sshll.u32 %s820_s21, 4  ;;  %s733_s4 = int_to_ptr.vmem [resolvable:$false] %s732_s4 }
  0x60   : > { %585 = vmatprep.subr.bf16.mxu0 %v584_v7  ;;  %590 = vmatpush3.bf16.msra.mxu1 %v580_v4  ;;  %s734_s6 = scalar_lea.vmem %s733_s4, 2048  ;;  %p735_p12 = scmp.lt.s32.totalorder %s1037_s9, %s733_s4 }
  0x61   : > { %589 = vmatprep.subr.bf16.mxu1 %v584_v7  ;;  %p730_p6 = pnand %p729_p13, %p942_p10  ;;  %p736_p11 = scmp.lt.s32.totalorder %s734_s6, %s728_s26 }
  0x63   : > { %239 = vxpose.xlu0.b32.cont [3/4] (short) (narrow) %v224_v8, 64  ;;  %587 = vmatpush3.bf16.msra.mxu0 %v584_v7  ;;  %p731_p8 = pneg %p730_p6  ;;  %p737_p0 = por %p736_p11, %p735_p12 }
  0x64   : > { %591 = vmatpush3.bf16.msra.mxu1 %v584_v7 }
  0x65   : > { %p738_p5 = pnand %p737_p0, %p731_p8 }
  0x67   : > { %240 = vxpose.xlu0.b32.end [4/4] (short) (narrow) %v225_v9, 64 }
  0xdb   : > { %v253_v10 = vpop.trf.xlu0 }
  0xdc   : > { %568 = vmatprep.mubr.msk.f32.mxu0 %vm269_vm0, %v253_v10 }
  0xdf   : > { %v254_v11 = vpop.trf.xlu0 }
  0xe0   : > { %569 = vmatmul.mubr.msk.f32.vlgmr.msra.gmra.mrb[0].mxu0 %vm269_vm0, %v254_v11 }
  0xe3   : > { %v255_v12 = vpop.trf.xlu0 }
  0xe4   : > { %571 = vmatprep.mubr.msk.f32.mxu0 %vm269_vm0, %v255_v12 }
  0xe7   : > { %v256_v13 = vpop.trf.xlu0 }
  0xe8   : > { %572 = vmatmul.mubr.msk.f32.gmra.mrb[2].mxu0 %vm269_vm0, %v256_v13 }
  0xeb   : > { %v257_v14 = vpop.trf.xlu0 }
  0xec   : > { %574 = vmatprep.mubr.msk.f32.mxu1 %vm269_vm0, %v257_v14 }
  0xef   : > { %v258_v15 = vpop.trf.xlu0 }
  0xf0   : > { %575 = vmatmul.mubr.msk.f32.vlgmr.msra.gmra.mrb[0].mxu1 %vm269_vm0, %v258_v15 }
  0xf3   : > { %v259_v16 = vpop.trf.xlu0 }
  0xf4   : > { %577 = vmatprep.mubr.msk.f32.mxu1 %vm269_vm0, %v259_v16 }
  0xf7   : > { %v260_v17 = vpop.trf.xlu0 }
  0xf8   : > { %578 = vmatmul.mubr.msk.f32.gmra.mrb[2].mxu1 %vm269_vm0, %v260_v17 }
 0x1b3   : > { %v570_v19 = vpop.f32.mrb[0].mxu0 }
 0x1b4   : > { %v366_v20 = vadd.f32 %v570_v19, %v532_v18  ;;  %v360_v21 = vpop.f32.mrb[1].mxu0 }
 0x1b5   : > { %v361_v22 = vadd.f32 %v532_v18, %v360_v21 }
 0x1b6   : > { %401 = vst.msk [vmem:[%s220_s10 + $0x8] sm:$0xff] %vm399_vm1, %v366_v20 }
 0x1b7   : > { %400 = vst.msk [vmem:[%s220_s10] sm:$0xff] %vm399_vm1, %v361_v22 }
 0x1bb   : > { %v573_v23 = vpop.f32.mrb[2].mxu0 }
 0x1bc   : > { %v376_v24 = vadd.f32 %v573_v23, %v532_v18  ;;  %v370_v25 = vpop.f32.mrb[3].mxu0 }
 0x1bd   : > { %v371_v26 = vadd.f32 %v532_v18, %v370_v25 }
 0x1be   : > { %403 = vst.msk [vmem:[%s220_s10 + $0x18] sm:$0xff] %vm399_vm1, %v376_v24 }
 0x1bf   : > { %402 = vst.msk [vmem:[%s220_s10 + $0x10] sm:$0xff] %vm399_vm1, %v371_v26 }
 0x1c3   : > { %v576_v27 = vpop.f32.mrb[0].mxu1 }
 0x1c4   : > { %v386_v28 = vadd.f32 %v576_v27, %v532_v18  ;;  %v380_v29 = vpop.f32.mrb[1].mxu1 }
 0x1c5   : > { %v381_v30 = vadd.f32 %v532_v18, %v380_v29 }
 0x1c6   : > { %405 = vst.msk [vmem:[%s220_s10 + $0x28] sm:$0xff] %vm399_vm1, %v386_v28 }
 0x1c7   : > { %404 = vst.msk [vmem:[%s220_s10 + $0x20] sm:$0xff] %vm399_vm1, %v381_v30 }
 0x1cb   : > { %v579_v31 = vpop.f32.mrb[2].mxu1 }
 0x1cc   : > { %v396_v32 = vadd.f32 %v579_v31, %v532_v18  ;;  %v390_v33 = vpop.f32.mrb[3].mxu1 }
 0x1cd   : > { %v391_v34 = vadd.f32 %v532_v18, %v390_v33 }
 0x1ce   : > { %407 = vst.msk [vmem:[%s220_s10 + $0x38] sm:$0xff] %vm399_vm1, %v396_v32 }
 0x1cf   : > { %406 = vst.msk [vmem:[%s220_s10 + $0x30] sm:$0xff] %vm399_vm1, %v391_v34 }
 0x1d0   : > { %741 = shalt.err (!%p738_p5)
}
 0x1d1   : > { %s742_s29 = scalar_lea.hbm %s1035_s25, 1024  ;;  %s746_s20 = scalar_lea.hbm %s1091_s3, 2048 }
 0x1d2   : > { %p743_p9 = scmp.ne.s32.totalorder %s1035_s25, %s742_s29  ;;  %p747_p3 = scmp.lt.u32.totalorder %s1035_s25, %s1091_s3 }
 0x1d3   : > { %p748_p7 = scmp.lt.u32.totalorder %s746_s20, %s742_s29  ;;  %p750_p13 = scmp.lt.u32.totalorder %s742_s29, %s1035_s25 }
 0x1d4   : > { %p744_p1 = pnand %p743_p9, %p942_p10 }
 0x1d5   : > { %p749_p4 = por %p748_p7, %p747_p3 }
 0x1d6   : > { %p745_p2 = pneg %p744_p1 }
 0x1d7   : > { %p751_p6 = por %p750_p13, %p749_p4 }
 0x1d9   : > { %p752_p8 = pnand %p751_p6, %p745_p2 }
 0x1db   : > { %755 = shalt.err (!%p752_p8)
}
 0x1dc   : > { %s821_s10 = smov 128   ;;  %s822_s11 = smov 8  }
 0x1dd   : > { %598 = dma.vmem_to_hbm [thread:$0]  (%p942_p10), %s1037_s9, 1024, %s1035_s25, %s409_s15, %s821_s10, %s821_s10, %s822_s11  }
 0x1de PF: > { %s439_s18 = sand.u32 1, %s794_s12   ;;  %p1109_p12 = scmp.ne.s32.totalorder %s1099_s23, 0 }
 0x1df   : > { %p1110_p11 = scmp.ge.s32.totalorder %s814_s17, 2  ;;  %s440_s19 = scalar_lea.sflag [#allocation4], %s439_s18 }
 0x1e1   : > { %p609_p0 = pnand %p1110_p11, %p1109_p12 }
 0x1e3   : > { %789 = dma.done.wait (!%p609_p0), %s440_s19, 1024  }
 0x1e4   : > { %791 = vsyncadd (!%p609_p0), %s440_s19, 4294966272  ;;  %s20_s17 = sadd.s32 1, %s814_s17   ;;  %s1111_s12 = smov %s798_s13 }
 0x1e5   : > { %p17_p5 = scmp.ge.s32.totalorder %s20_s17, 4   ;;  %s1112_s13 = smov %s802_s14 }
 0x1e6   : > { %s1113_s14 = smov %s951_s5  ;;  %s1114_s15 = smov %s810_s16 }
 0x1e7   : > { %s1115_s16 = smov %s1117_s28  ;;  %19 = sbr.rel (!%p17_p5) target bundleno = 7 (0x7), region = 81 }
 0x1ee   :  { %445 = vsyncpa [#allocation3], 1 }
 0x1ef   :  { %447 = vsyncpa [#allocation3 + $0x1], 1 }
 0x1f0   :  { %448 = vsyncpa [#allocation6], 1 }
 0x1f1   :  { %449 = vsyncpa [#allocation4], 1 }
 0x1f2   :  { %451 = vsyncpa [#allocation4 + $0x1], 1 }

</bundles_post_ra>
